<compile_context>
chip_gen: v6e
topology: v6e:2x2x1
jax: 0.10.0
libtpu: 0.0.40
codegen_flags: <defaults>
</compile_context>

<pallas_src>
import jax
import jax.numpy as jnp
from jax.experimental import pallas as pl
from jax.experimental.pallas import tpu as pltpu


def _round_up(n: int, m: int) -> int:
    return ((n + m - 1) // m) * m


def fcnet_kernel(x_ref, w1_ref, b1_ref, w2_ref, b2_ref, w3_ref, b3_ref, o_ref):
    """One batch tile: x (TB, D) -> sigmoid(fc3(relu(fc2(relu(fc1(x)))))) as a (1, TB) row."""
    # Cast the x tile to the MXU compute dtype in-kernel (cheap VPU work hidden under the
    # x DMA); this avoids a separate whole-array cast pass in HBM.
    x_c = x_ref[...].astype(w1_ref.dtype)                # (TB, D) bf16

    # fc1, batch-on-lanes: h1[o, j] = sum_d W1[o, d] * x[j, d]
    # "NT" MXU matmul (contract the trailing dim of both operands), bf16 in / f32 accum.
    h1 = jax.lax.dot_general(
        w1_ref[...], x_c,
        dimension_numbers=(((1,), (1,)), ((), ())),
        preferred_element_type=jnp.float32,
    )                                                    # (128, TB) f32
    h1 = jnp.maximum(h1 + b1_ref[...], 0.0)              # bias lane-broadcast + ReLU, f32
    # dropout1: eval-mode identity.

    # fc2 on the MXU.  h1 is cast to the MXU dtype only as a dot operand; the stored
    # activation / elementwise path stays f32 (v5e has no bf16 VPU).
    h2 = jax.lax.dot_general(
        w2_ref[...], h1.astype(w2_ref.dtype),
        dimension_numbers=(((1,), (0,)), ((), ())),
        preferred_element_type=jnp.float32,
    )                                                    # (32, TB) f32
    h2 = jnp.maximum(h2 + b2_ref[...], 0.0)
    # dropout2: eval-mode identity.

    # fc3 (32 -> 1): kept off the MXU.  VPU multiply + sublane reduce (XLU) lands the
    # result already lane-dense as a (1, TB) row; fc3 bias comes in as an SMEM scalar.
    z = jnp.sum(h2 * w3_ref[...], axis=0, keepdims=True) + b3_ref[0]   # (1, TB) f32
    o_ref[...] = jax.nn.sigmoid(z).astype(o_ref.dtype)


def fcnet_forward(x, fc1_w, fc1_b, fc2_w, fc2_b, fc3_w, fc3_b,
                  *, block_rows=1024, compute_dtype=jnp.bfloat16):
    """Pallas FCNet forward.  Weights/biases use the PyTorch nn.Linear layout:
    fc1_w (128, D), fc1_b (128,), fc2_w (32, 128), fc2_b (32,), fc3_w (1, 32), fc3_b (1,).
    Returns (B, 1) float32.
    """
    B, D = x.shape
    H1 = fc1_w.shape[0]
    H2 = fc2_w.shape[0]
    assert fc1_w.shape == (H1, D)
    assert fc2_w.shape == (H2, H1)
    assert fc3_w.shape == (1, H2)

    # TODO(synk): for tiny batches (<~1k rows) a plain fused XLA dot chain beats a
    # standalone pallas_call (launch/DMA-descriptor overhead dominates ~21k MACs).

    # Tile rows: multiple of 128 so the lane-dense (1, TB) output block is unmasked and
    # sublane constraints hold at any dtype.
    tb = max(128, min(_round_up(block_rows, 128), _round_up(B, 128)))
    b_pad = _round_up(B, tb)
    n_tiles = b_pad // tb

    # Pad the batch axis only if the tile does not divide it (single extra copy of x in
    # that case).  x itself is NOT pre-cast: the kernel casts per-tile, saving an HBM pass.
    x_p = x if b_pad == B else jnp.pad(x, ((0, b_pad - B), (0, 0)))
    # Weights are tiny; cast the MXU operands to the compute dtype once.  Biases and the
    # tiny fc3 weight stay f32 for the VPU/EUP path.
    w1 = fc1_w.astype(compute_dtype)
    w2 = fc2_w.astype(compute_dtype)
    b1 = fc1_b.reshape(H1, 1).astype(jnp.float32)
    b2 = fc2_b.reshape(H2, 1).astype(jnp.float32)
    w3 = fc3_w.reshape(H2, 1).astype(jnp.float32)   # column vector -> broadcasts over lanes
    b3 = fc3_b.reshape(1).astype(jnp.float32)       # scalar, lives in SMEM

    out_row = pl.pallas_call(
        fcnet_kernel,
        out_shape=jax.ShapeDtypeStruct((1, b_pad), jnp.float32),
        grid=(n_tiles,),
        in_specs=[
            pl.BlockSpec((tb, D), lambda i: (i, 0)),       # x tile, pipelined over batch
            pl.BlockSpec((H1, D), lambda i: (0, 0)),       # weights/biases: constant maps,
            pl.BlockSpec((H1, 1), lambda i: (0, 0)),       #   stay resident in VMEM
            pl.BlockSpec((H2, H1), lambda i: (0, 0)),
            pl.BlockSpec((H2, 1), lambda i: (0, 0)),
            pl.BlockSpec((H2, 1), lambda i: (0, 0)),
            pl.BlockSpec(memory_space=pltpu.MemorySpace.SMEM),   # fc3 bias scalar
        ],
        out_specs=pl.BlockSpec((1, tb), lambda i: (0, i)),  # lane-dense output row
        compiler_params=pltpu.CompilerParams(
            dimension_semantics=("parallel",),              # shard batch tiles across TCs
        ),
    )(x_p, w1, b1, w2, b2, w3, b3)

    return out_row[0, :B].reshape(B, 1)


def fcnet_reference(x, fc1_w, fc1_b, fc2_w, fc2_b, fc3_w, fc3_b,
                    compute_dtype=jnp.bfloat16):
    """Pure-JAX reference with the same mixed-precision recipe as the kernel."""
    xc = x.astype(compute_dtype)
    h1 = jax.lax.dot_general(
        xc, fc1_w.astype(compute_dtype),
        dimension_numbers=(((1,), (1,)), ((), ())),
        preferred_element_type=jnp.float32)
    h1 = jnp.maximum(h1 + fc1_b.astype(jnp.float32)[None, :], 0.0)
    h2 = jax.lax.dot_general(
        h1.astype(compute_dtype), fc2_w.astype(compute_dtype),
        dimension_numbers=(((1,), (1,)), ((), ())),
        preferred_element_type=jnp.float32)
    h2 = jnp.maximum(h2 + fc2_b.astype(jnp.float32)[None, :], 0.0)
    z = jnp.sum(h2 * fc3_w.astype(jnp.float32), axis=-1, keepdims=True)
    z = z + fc3_b.astype(jnp.float32)[None, :]
    return jax.nn.sigmoid(z)


if __name__ == "__main__":
    key = jax.random.PRNGKey(0)
    kx, k1, k2, k3, k4, k5, k6 = jax.random.split(key, 7)

    batch = 200          # small, but > one 128-row tile -> exercises grid + padding path
    input_size = 64      # stand-in for CONFIG.LENGTH

    x = jax.random.normal(kx, (batch, input_size), jnp.float32)

    def uinit(k, shape, fan_in):
        bound = 1.0 / (fan_in ** 0.5)
        return jax.random.uniform(k, shape, jnp.float32, -bound, bound)

    fc1_w = uinit(k1, (128, input_size), input_size)
    fc1_b = uinit(k2, (128,), input_size)
    fc2_w = uinit(k3, (32, 128), 128)
    fc2_b = uinit(k4, (32,), 128)
    fc3_w = uinit(k5, (1, 32), 32)
    fc3_b = uinit(k6, (1,), 32)

    out = fcnet_forward(x, fc1_w, fc1_b, fc2_w, fc2_b, fc3_w, fc3_b, block_rows=128)
    out = jax.block_until_ready(out)

    ref = fcnet_reference(x, fc1_w, fc1_b, fc2_w, fc2_b, fc3_w, fc3_b)

    assert out.shape == (batch, 1), out.shape
    assert bool(jnp.all(jnp.isfinite(out))), "non-finite output"
    max_err = float(jnp.max(jnp.abs(out - ref)))
    assert jnp.allclose(out, ref, atol=1e-3, rtol=1e-3), f"mismatch vs reference: {max_err}"
    print("KERNEL_OK")
</pallas_src>

<mosaic_0001>
module attributes {stable_mosaic.version = 11 : i64} {
  func.func @fcnet_kernel(%arg0: i32, %arg1: memref<128x64xf32, #tpu.memory_space<vmem>>, %arg2: memref<128x64xbf16, #tpu.memory_space<vmem>>, %arg3: memref<128x1xf32, #tpu.memory_space<vmem>>, %arg4: memref<32x128xbf16, #tpu.memory_space<vmem>>, %arg5: memref<32x1xf32, #tpu.memory_space<vmem>>, %arg6: memref<32x1xf32, #tpu.memory_space<vmem>>, %arg7: memref<1xf32, #tpu.memory_space<smem>>, %arg8: memref<1x128xf32, #tpu.memory_space<vmem>>) attributes {dimension_semantics = [#tpu.dimension_semantics<parallel>], iteration_bounds = array<i64: 2>, scalar_prefetch = 0 : i64, scratch_operands = 0 : i64, tpu.core_type = #tpu.core_type<tc>, window_params = [{transform_indices = @transform_0, window_bounds = array<i64: 128, 64>}, {pipeline_mode = #tpu.pipeline_mode<synchronous>, transform_indices = @transform_1, window_bounds = array<i64: 128, 64>}, {pipeline_mode = #tpu.pipeline_mode<synchronous>, transform_indices = @transform_2, window_bounds = array<i64: 128, 1>}, {pipeline_mode = #tpu.pipeline_mode<synchronous>, transform_indices = @transform_3, window_bounds = array<i64: 32, 128>}, {pipeline_mode = #tpu.pipeline_mode<synchronous>, transform_indices = @transform_4, window_bounds = array<i64: 32, 1>}, {pipeline_mode = #tpu.pipeline_mode<synchronous>, transform_indices = @transform_5, window_bounds = array<i64: 32, 1>}, {transform_indices = @transform_6, window_bounds = array<i64: 1>}, {transform_indices = @transform_7, window_bounds = array<i64: 1, 128>}]} {
    %c0 = arith.constant 0 : index
    %c0_0 = arith.constant 0 : index
    %0 = vector.load %arg1[%c0, %c0_0] : memref<128x64xf32, #tpu.memory_space<vmem>>, vector<128x64xf32>
    %1 = arith.truncf %0 : vector<128x64xf32> to vector<128x64xbf16>
    %c0_1 = arith.constant 0 : index
    %c0_2 = arith.constant 0 : index
    %2 = vector.load %arg2[%c0_1, %c0_2] : memref<128x64xbf16, #tpu.memory_space<vmem>>, vector<128x64xbf16>
    %cst = arith.constant dense<0.000000e+00> : vector<128x128xf32>
    %3 = tpu.matmul %2, %1, %cst {dimension_numbers = #tpu.dot_dimension_numbers<[1], [1], [0], [0], [0, 0, 1, 0], [], []>} : vector<128x64xbf16>, vector<128x64xbf16>, vector<128x128xf32> -> vector<128x128xf32>
    %c0_3 = arith.constant 0 : index
    %c0_4 = arith.constant 0 : index
    %4 = vector.load %arg3[%c0_3, %c0_4] : memref<128x1xf32, #tpu.memory_space<vmem>>, vector<128x1xf32>
    %5 = vector.broadcast %4 : vector<128x1xf32> to vector<128x128xf32>
    %6 = arith.addf %3, %5 : vector<128x128xf32>
    %cst_5 = arith.constant 0.000000e+00 : f32
    %7 = vector.broadcast %cst_5 : f32 to vector<128x128xf32>
    %8 = arith.maximumf %6, %7 : vector<128x128xf32>
    %c0_6 = arith.constant 0 : index
    %c0_7 = arith.constant 0 : index
    %9 = vector.load %arg4[%c0_6, %c0_7] : memref<32x128xbf16, #tpu.memory_space<vmem>>, vector<32x128xbf16>
    %10 = arith.truncf %8 : vector<128x128xf32> to vector<128x128xbf16>
    %cst_8 = arith.constant dense<0.000000e+00> : vector<32x128xf32>
    %11 = tpu.matmul %9, %10, %cst_8 {dimension_numbers = #tpu.dot_dimension_numbers<[1], [0], [0], [1], [0, 0, 1, 1], [], []>} : vector<32x128xbf16>, vector<128x128xbf16>, vector<32x128xf32> -> vector<32x128xf32>
    %c0_9 = arith.constant 0 : index
    %c0_10 = arith.constant 0 : index
    %12 = vector.load %arg5[%c0_9, %c0_10] : memref<32x1xf32, #tpu.memory_space<vmem>>, vector<32x1xf32>
    %13 = vector.broadcast %12 : vector<32x1xf32> to vector<32x128xf32>
    %14 = arith.addf %11, %13 : vector<32x128xf32>
    %cst_11 = arith.constant 0.000000e+00 : f32
    %15 = vector.broadcast %cst_11 : f32 to vector<32x128xf32>
    %16 = arith.maximumf %14, %15 : vector<32x128xf32>
    %c0_12 = arith.constant 0 : index
    %c0_13 = arith.constant 0 : index
    %17 = vector.load %arg6[%c0_12, %c0_13] : memref<32x1xf32, #tpu.memory_space<vmem>>, vector<32x1xf32>
    %18 = vector.broadcast %17 : vector<32x1xf32> to vector<32x128xf32>
    %19 = arith.mulf %16, %18 : vector<32x128xf32>
    %cst_14 = arith.constant dense<0.000000e+00> : vector<128xf32>
    %20 = vector.multi_reduction <add>, %19, %cst_14 [0] : vector<32x128xf32> to vector<128xf32>
    %21 = vector.shape_cast %20 : vector<128xf32> to vector<1x128xf32>
    %c0_15 = arith.constant 0 : index
    %22 = memref.load %arg7[%c0_15] : memref<1xf32, #tpu.memory_space<smem>>
    %23 = vector.broadcast %22 : f32 to vector<1x128xf32>
    %24 = arith.addf %21, %23 : vector<1x128xf32>
    %25 = arith.negf %24 : vector<1x128xf32>
    %26 = math.exp %25 : vector<1x128xf32>
    %cst_16 = arith.constant 1.000000e+00 : f32
    %27 = vector.broadcast %cst_16 : f32 to vector<1x128xf32>
    %28 = arith.addf %27, %26 : vector<1x128xf32>
    %29 = arith.divf %27, %28 : vector<1x128xf32>
    %c0_17 = arith.constant 0 : index
    %c0_18 = arith.constant 0 : index
    %30 = vector.load %arg8[%c0_17, %c0_18] : memref<1x128xf32, #tpu.memory_space<vmem>>, vector<1x128xf32>
    tpu.vector_store %arg8[%c0_17, %c0_18], %29 {strides = array<i32>} : memref<1x128xf32, #tpu.memory_space<vmem>>, vector<1x128xf32>,
    return
  }
  func.func @transform_0(%arg0: i32) -> (i32, i32) {
    %c0_i32 = arith.constant 0 : i32
    %c0_i32_0 = arith.constant 0 : i32
    return %arg0, %c0_i32 : i32, i32
  }
  func.func @transform_1(%arg0: i32) -> (i32, i32) {
    %c0_i32 = arith.constant 0 : i32
    %c0_i32_0 = arith.constant 0 : i32
    %c0_i32_1 = arith.constant 0 : i32
    return %c0_i32, %c0_i32_0 : i32, i32
  }
  func.func @transform_2(%arg0: i32) -> (i32, i32) {
    %c0_i32 = arith.constant 0 : i32
    %c0_i32_0 = arith.constant 0 : i32
    %c0_i32_1 = arith.constant 0 : i32
    return %c0_i32, %c0_i32_0 : i32, i32
  }
  func.func @transform_3(%arg0: i32) -> (i32, i32) {
    %c0_i32 = arith.constant 0 : i32
    %c0_i32_0 = arith.constant 0 : i32
    %c0_i32_1 = arith.constant 0 : i32
    return %c0_i32, %c0_i32_0 : i32, i32
  }
  func.func @transform_4(%arg0: i32) -> (i32, i32) {
    %c0_i32 = arith.constant 0 : i32
    %c0_i32_0 = arith.constant 0 : i32
    %c0_i32_1 = arith.constant 0 : i32
    return %c0_i32, %c0_i32_0 : i32, i32
  }
  func.func @transform_5(%arg0: i32) -> (i32, i32) {
    %c0_i32 = arith.constant 0 : i32
    %c0_i32_0 = arith.constant 0 : i32
    %c0_i32_1 = arith.constant 0 : i32
    return %c0_i32, %c0_i32_0 : i32, i32
  }
  func.func @transform_6(%arg0: i32) -> i32 {
    %c0_i32 = arith.constant 0 : i32
    %c0_i32_0 = arith.constant 0 : i32
    return %c0_i32 : i32
  }
  func.func @transform_7(%arg0: i32) -> (i32, i32) {
    %c0_i32 = arith.constant 0 : i32
    %c0_i32_0 = arith.constant 0 : i32
    return %c0_i32, %arg0 : i32, i32
  }
}

</mosaic_0001>

<bundles_post_ra>
// kernel: tpu_custom_call.1
= control target key start
LH: loop header
LB: loop body
LE: loop exit
PB: predicated region body
PF: predicated region fallthrough
CT: control target
= control target key end

     0   :  { %s1356_s0 = inlined_call_operand.vmem [shape: f32[256,64], index: 0, kind: input, shape index: {}]   ;;  %s1357_s1 = inlined_call_operand.vmem [shape: bf16[128,64], index: 1, kind: input, shape index: {}]   ;;  %s1358_s2 = inlined_call_operand.vmem [shape: f32[128,1], index: 2, kind: input, shape index: {}]   ;;  %s1359_s3 = inlined_call_operand.vmem [shape: bf16[32,128], index: 3, kind: input, shape index: {}]   ;;  %s1360_s4 = inlined_call_operand.vmem [shape: f32[32,1], index: 4, kind: input, shape index: {}]   ;;  %s1361_s5 = inlined_call_operand.vmem [shape: f32[32,1], index: 5, kind: input, shape index: {}]   ;;  %s1362_s6 = inlined_call_operand.<no memory space> [shape: f32[1], index: 6, kind: input, shape index: {}]   ;;  %s1363_s7 = inlined_call_operand.hbm [shape: f32[1,256], index: 7, kind: output, shape index: {}]  }
   0x1   :  { %12 = sst [smem:[#allocation2]] %s1362_s6 }
   0x2   :  { %13 = vsyncpa [#allocation4], 0 }
   0x3   :  { %15 = vsyncpa [#allocation4 + $0x1], 0  ;;  %s1111_s26 = smov 0   ;;  %s1113_s27 = smov 0  }
   0x4   :  { %s1115_s28 = smov 0   ;;  %s1117_s29 = smov 0  }
   0x5 LB: > { %s833_s6 = sadd.s32 4294967295, %s1064_s29   ;;  %s834_s30 = sadd.s32 4294967294, %s1064_s29   ;;  %s1064_s29 = sphi %s1117_s29, %s1369_s29   ;;  %s1060_s28 = sphi %s1115_s28, %s1368_s28   ;;  %s1056_s27 = sphi %s1113_s27, %s1367_s27   ;;  %s1052_s26 = sphi %s1111_s26, %s1366_s26  }
   0x6   : > { %s1134_s8 = sadd.s32 1, %s1064_s29   ;;  %s180_s9 = sadd.s32 1, %s1060_s28 }
   0x7   : > { %s177_s10 = ssub.s32 %s1064_s29, %s1134_s8  ;;  %p190_p0 = scmp.ne.s32.totalorder %s1060_s28, %s1056_s27 }
   0x8   : > { %p178_p1 = scmp.eq.s32.totalorder %s177_s10, 0  ;;  %p191_p2 = scmp.eq.s32.totalorder %s833_s6, 1 }
   0x9   : > { %p196_p3 = scmp.ne.s32.totalorder %s1056_s27, %s1052_s26  ;;  %p197_p4 = scmp.eq.s32.totalorder %s834_s30, 1 }
   0xa   : > { %s1144_s11 = scalar_select %p178_p1, %s1060_s28, %s180_s9  }
   0xb   : > { %p1146_p5 = por %p191_p2, %p190_p0  ;;  %p1150_p6 = por %p197_p4, %p196_p3 }
   0xc   : > { %p837_p7 = scmp.ge.s32.totalorder %s1064_s29, 1  ;;  %p242_p8 = scmp.lt.s32.totalorder %s1064_s29, 3 }
   0xe   : > { %p243_p9 = pnand %p837_p7, %p242_p8 }
   0xf   : > { %s1156_s14 = sshll.u32 (!%p243_p9), %s833_s6, 4  ;;  %s756_s15 = sld [smem:[#allocation2]] (!%p243_p9) }
  0x10   : > { %246 = sbr.rel (%p243_p9) target bundleno = 621 (0x26d), region = 48  ;;  %p274_p10 = scmp.lt.s32.totalorder (!%p243_p9), %s1156_s14, 31 }
  0x11   : > { %s271_s16 = sand.u32 (!%p243_p9), 1, %s1056_s27   ;;  %s1321_s22 = scalar_lea.hbm (!%p243_p9), %s1363_s7, %s1156_s14 }
  0x12   : > { %s767_s23 = scalar_lea.sflag (!%p243_p9), [#allocation4], %s271_s16  ;;  %s1067_s25 = smov (!%p243_p9), [#allocation3]  }
  0x13   : > { %s1008_s6 = sshll.u32 (!%p243_p9), %s1067_s25, 4  ;;  %s1009_s6 = int_to_ptr.vmem [resolvable:$false] %s1008_s6 }
  0x14   : > { %s1010_s30 = scalar_lea.vmem (!%p243_p9), %s1009_s6, 32 }
  0x15   : > { %v990_v0 = vld [vmem:[%s1357_s1] sm:$0xff]   ;;  %vm456_vm0 = vcmask 523264   ;;  %s275_s17 = scalar_select %p274_p10, %s1156_s14, 31  ;;  %v1066_v1 = vmov 0   ;;  %v334_v11 = vld [vmem:[%s1358_s2 + $0x70] sm:$0xff]  ;;  %v335_v13 = vld [vmem:[%s1358_s2 + $0x78] sm:$0xff] }
  0x16   : > { %904 = vmatprep.mubr.msk.bf16.mxu0 %vm456_vm0, %v990_v0  ;;  %988 = vset.pattern.permute.xlu0 %v1066_v1  ;;  %v332_v12 = vld [vmem:[%s1358_s2 + $0x60] sm:$0xff]  ;;  %v333_v16 = vld [vmem:[%s1358_s2 + $0x68] sm:$0xff]  ;;  %v330_v17 = vld [vmem:[%s1358_s2 + $0x50] sm:$0xff] }
  0x17   : > { %989 = vset.pattern.permute.xlu1 %v1066_v1  ;;  %s839_s18 = sshll.u32 %s275_s17, 3  ;;  %408 = vperm.xlu0 %988, %v334_v11   ;;  %v331_v18 = vld [vmem:[%s1358_s2 + $0x58] sm:$0xff]  ;;  %v328_v21 = vld [vmem:[%s1358_s2 + $0x40] sm:$0xff]  ;;  %v329_v24 = vld [vmem:[%s1358_s2 + $0x48] sm:$0xff]  ;;  %s272_s17 = scalar_lea.vmem [#allocation3], %s271_s16 }
  0x18   : > { %s1167_s21 = scalar_lea.vmem %s1356_s0, %s839_s18  ;;  %398 = vperm.xlu1 %989, %v332_v12   ;;  %v326_v25 = vld [vmem:[%s1358_s2 + $0x30] sm:$0xff]  ;;  %v327_v26 = vld [vmem:[%s1358_s2 + $0x38] sm:$0xff]  ;;  %v324_v29 = vld [vmem:[%s1358_s2 + $0x20] sm:$0xff]  ;;  %s779_s18 = sshll.u32 %s272_s17, 4  ;;  %s780_s18 = int_to_ptr.vmem [resolvable:$true] %s779_s18 }
  0x19   : > { %v294_v2 = vld [vmem:[%s1167_s21 + $0x70] sm:$0xff]  ;;  %v295_v3 = vld [vmem:[%s1167_s21 + $0x78] sm:$0xff]  ;;  %v292_v4 = vld [vmem:[%s1167_s21 + $0x60] sm:$0xff]  ;;  %s1004_s24 = scalar_lea.vmem %s780_s18, 16  ;;  %p1011_p0 = scmp.lt.s32.totalorder %s780_s18, %s1009_s6 }
  0x1a   : > { %v303_v5 = vpack.c.bf16 %v295_v3, %v294_v2  ;;  %v293_v6 = vld [vmem:[%s1167_s21 + $0x68] sm:$0xff]  ;;  %v290_v9 = vld [vmem:[%s1167_s21 + $0x50] sm:$0xff]  ;;  %v291_v10 = vld [vmem:[%s1167_s21 + $0x58] sm:$0xff]  ;;  %p1005_p11 = scmp.ne.s32.totalorder %s780_s18, %s1004_s24  ;;  %p1012_p1 = scmp.lt.s32.totalorder %s1010_s30, %s1004_s24 }
  0x1b   : > { %v302_v7 = vpack.c.bf16 %v293_v6, %v292_v4  ;;  %v301_v15 = vpack.c.bf16 %v291_v10, %v290_v9  ;;  %413 = vperm.xlu0 %988, %v335_v13   ;;  %v288_v19 = vld [vmem:[%s1167_s21 + $0x40] sm:$0xff]  ;;  %v289_v20 = vld [vmem:[%s1167_s21 + $0x48] sm:$0xff]  ;;  %v286_v27 = vld [vmem:[%s1167_s21 + $0x30] sm:$0xff] }
  0x1c   : > { %940 = vmatprep.subr.msk.bf16.mxu0 %vm456_vm0, %v303_v5  ;;  %v503_v8 = vsel %vm456_vm0, %v303_v5, 0  ;;  %403 = vperm.xlu1 %989, %v333_v16   ;;  %v300_v23 = vpack.c.bf16 %v289_v20, %v288_v19  ;;  %v287_v28 = vld [vmem:[%s1167_s21 + $0x38] sm:$0xff]  ;;  %v325_v32 = vld [vmem:[%s1358_s2 + $0x28] sm:$0xff]  ;;  %v322_v33 = vld [vmem:[%s1358_s2 + $0x10] sm:$0xff]  ;;  %p1006_p12 = pnand %p1005_p11, %p1146_p5  ;;  %p1013_p2 = por %p1012_p1, %p1011_p0 }
  0x1d   : > { %889 = vmatpush3.bf16.xpose.msra.mxu0 %v503_v8  ;;  %v500_v14 = vsel %vm456_vm0, %v302_v7, 0  ;;  %v497_v22 = vsel %vm456_vm0, %v301_v15, 0  ;;  %v299_v31 = vpack.c.bf16 %v287_v28, %v286_v27  ;;  %v323_v34 = vld [vmem:[%s1358_s2 + $0x18] sm:$0xff]  ;;  %v284_v35 = vld [vmem:[%s1167_s21 + $0x20] sm:$0xff]  ;;  %v285_v36 = vld [vmem:[%s1167_s21 + $0x28] sm:$0xff] }
  0x1e   : > { %941 = vmatprep.subr.msk.bf16.mxu0 %vm456_vm0, %v302_v7  ;;  %v494_v30 = vsel %vm456_vm0, %v300_v23, 0  ;;  %v320_v37 = vld [vmem:[%s1358_s2] sm:$0xff]  ;;  %v298_v39 = vpack.c.bf16 %v285_v36, %v284_v35  ;;  %v321_v40 = vld [vmem:[%s1358_s2 + $0x8] sm:$0xff]  ;;  %v282_v43 = vld [vmem:[%s1167_s21 + $0x10] sm:$0xff]  ;;  %p1007_p13 = pneg %p1006_p12 }
  0x1f   : > { %388 = vperm.xlu0 %988, %v330_v17   ;;  %v491_v38 = vsel %vm456_vm0, %v299_v31, 0  ;;  %v630_v41 = vld [vmem:[%s1360_s4] sm:$0xff]  ;;  %v631_v42 = vld [vmem:[%s1360_s4 + $0x8] sm:$0xff]  ;;  %v283_v44 = vld [vmem:[%s1167_s21 + $0x18] sm:$0xff] }
  0x20   : > { %393 = vperm.xlu1 %989, %v331_v18   ;;  %v632_v45 = vld [vmem:[%s1360_s4 + $0x10] sm:$0xff]  ;;  %v488_v46 = vsel %vm456_vm0, %v298_v39, 0  ;;  %v297_v47 = vpack.c.bf16 %v283_v44, %v282_v43  ;;  %v633_v48 = vld [vmem:[%s1360_s4 + $0x18] sm:$0xff]  ;;  %v719_v49 = vld [vmem:[%s1361_s5] sm:$0xff]  ;;  %p1014_p3 = pnand %p1013_p2, %p1007_p13 }
  0x21   : > { %v720_v50 = vld [vmem:[%s1361_s5 + $0x8] sm:$0xff]  ;;  %v280_v51 = vld [vmem:[%s1167_s21] sm:$0xff]  ;;  %v721_v53 = vld [vmem:[%s1361_s5 + $0x10] sm:$0xff] }
  0x22   : > { %v281_v52 = vld [vmem:[%s1167_s21 + $0x8] sm:$0xff]  ;;  %v485_v54 = vsel %vm456_vm0, %v297_v47, 0  ;;  %v722_v56 = vld [vmem:[%s1361_s5 + $0x18] sm:$0xff]  ;;  %v992_v59 = vld [vmem:[%s1357_s1 + $0x10] sm:$0xff]  }
  0x23   : > { %378 = vperm.xlu0 %988, %v328_v21   ;;  %v296_v55 = vpack.c.bf16 %v281_v52, %v280_v51  ;;  %v991_v58 = vld [vmem:[%s1357_s1 + $0x8] sm:$0xff]   ;;  %v993_v60 = vld [vmem:[%s1357_s1 + $0x18] sm:$0xff]   ;;  %v994_v61 = vld [vmem:[%s1357_s1 + $0x20] sm:$0xff]  }
  0x24   : > { %383 = vperm.xlu1 %989, %v329_v24   ;;  %v995_v62 = vld [vmem:[%s1357_s1 + $0x28] sm:$0xff]   ;;  %v996_v63 = vld [vmem:[%s1357_s1 + $0x30] sm:$0xff]   ;;  %v997_v0 = vld [vmem:[%s1357_s1 + $0x38] sm:$0xff]  }
  0x25   : > { %891 = vmatpush3.bf16.xpose.msra.mxu0 %v500_v14  ;;  %v482_v57 = vsel %vm456_vm0, %v296_v55, 0  ;;  %v998_v1 = vld [vmem:[%s1359_s3] sm:$0xff]  }
  0x26   : > { %942 = vmatprep.subr.msk.bf16.mxu0 %vm456_vm0, %v301_v15  ;;  %936 = vmatprep.mubr.bf16.mxu1 %v998_v1 }
  0x27   : > { %368 = vperm.xlu0 %988, %v326_v25  }
  0x28   : > { %373 = vperm.xlu1 %989, %v327_v26  }
  0x2b   : > { %358 = vperm.xlu0 %988, %v324_v29  }
  0x2c   : > { %363 = vperm.xlu1 %989, %v325_v32  }
  0x2d   : > { %893 = vmatpush3.bf16.xpose.msra.mxu0 %v497_v22 }
  0x2e   : > { %943 = vmatprep.subr.msk.bf16.mxu0 %vm456_vm0, %v300_v23 }
  0x2f   : > { %348 = vperm.xlu0 %988, %v322_v33  }
  0x30   : > { %353 = vperm.xlu1 %989, %v323_v34  }
  0x33   : > { %338 = vperm.xlu0 %988, %v320_v37  }
  0x34   : > { %343 = vperm.xlu1 %989, %v321_v40  }
  0x35   : > { %895 = vmatpush3.bf16.xpose.msra.mxu0 %v494_v30 }
  0x36   : > { %944 = vmatprep.subr.msk.bf16.mxu0 %vm456_vm0, %v299_v31 }
  0x37   : > { %636 = vperm.xlu0 %988, %v630_v41  }
  0x38   : > { %641 = vperm.xlu1 %989, %v631_v42  }
  0x3b   : > { %646 = vperm.xlu0 %988, %v632_v45  }
  0x3c   : > { %651 = vperm.xlu1 %989, %v633_v48  }
  0x3d   : > { %897 = vmatpush3.bf16.xpose.msra.mxu0 %v491_v38 }
  0x3e   : > { %945 = vmatprep.subr.msk.bf16.mxu0 %vm456_vm0, %v298_v39 }
  0x3f   : > { %725 = vperm.xlu0 %988, %v719_v49  }
  0x40   : > { %730 = vperm.xlu1 %989, %v720_v50  }
  0x43   : > { %735 = vperm.xlu0 %988, %v721_v53  }
  0x44   : > { %740 = vperm.xlu1 %989, %v722_v56  }
  0x45   : > { %899 = vmatpush3.bf16.xpose.msra.mxu0 %v488_v46 }
  0x46   : > { %946 = vmatprep.subr.msk.bf16.mxu0 %vm456_vm0, %v297_v47 }
  0x4d   : > { %901 = vmatpush3.bf16.xpose.msra.mxu0 %v485_v54 }
  0x4e   : > { %947 = vmatprep.subr.msk.bf16.mxu0 %vm456_vm0, %v296_v55 }
  0x55   : > { %903 = vmatpush3.bf16.xpose.msra.mxu0 %v482_v57 }
  0x5c   : > { %905 = vmatmul.mubr.msk.bf16.vlgmr.msra.gmra.mxu0 %vm456_vm0, %v991_v58 }
  0x5d   : > { %908 = vmatprep.mubr.msk.bf16.mxu0 %vm456_vm0, %v992_v59 }
  0x64   : > { %909 = vmatmul.mubr.msk.bf16.gmra.mxu0 %vm456_vm0, %v993_v60 }
  0x65   : > { %912 = vmatprep.mubr.msk.bf16.mxu0 %vm456_vm0, %v994_v61 }
  0x6c   : > { %913 = vmatmul.mubr.msk.bf16.gmra.mxu0 %vm456_vm0, %v995_v62 }
  0x6d   : > { %916 = vmatprep.mubr.msk.bf16.mxu0 %vm456_vm0, %v996_v63 }
  0x74   : > { %917 = vmatmul.mubr.msk.bf16.gmra.mxu0 %vm456_vm0, %v997_v0 }
  0x92   : > { %v409_v7 = vpop.permute.xlu0 %408 }
  0x93   : > { %v399_v5 = vpop.permute.xlu1 %398 }
  0x96   : > { %v414_v12 = vpop.permute.xlu0 %413 }
  0x97   : > { %v404_v10 = vpop.permute.xlu1 %403 }
  0x9a   : > { %v389_v17 = vpop.permute.xlu0 %388 }
  0x9b   : > { %v394_v15 = vpop.permute.xlu1 %393 }
  0x9e   : > { %v379_v22 = vpop.permute.xlu0 %378 }
  0x9f   : > { %v384_v20 = vpop.permute.xlu1 %383 }
  0xa2   : > { %v369_v34 = vpop.permute.xlu0 %368 }
  0xa3   : > { %v374_v28 = vpop.permute.xlu1 %373 }
  0xa6   : > { %v359_v45 = vpop.permute.xlu0 %358 }
  0xa7   : > { %v364_v42 = vpop.permute.xlu1 %363 }
  0xaa   : > { %v349_v55 = vpop.permute.xlu0 %348 }
  0xab   : > { %v354_v51 = vpop.permute.xlu1 %353 }
  0xae   : > { %v339_v0 = vpop.permute.xlu0 %338 }
  0xaf   : > { %v344_v61 = vpop.permute.xlu1 %343 }
 0x11c   : > { %v1304_v2 = vpop.f32.mrf.mxu0 }
 0x11d   : > { %v548_v62 = vadd.f32 %v1304_v2, %v349_v55  ;;  %v999_v2 = vld [vmem:[%s1359_s3 + $0x8] sm:$0xff]  }
 0x11e   : > { %v1306_v3 = vpop.f32.mrf.mxu0 }
 0x120   : > { %v907_v4 = vpop.f32.mrf.mxu0 }
 0x121   : > { %v551_v58 = vadd.f32 %v907_v4, %v354_v51 }
 0x122   : > { %v1308_v6 = vpop.f32.mrf.mxu0 }
 0x123   : > { %v605_v1 = vmax.f32 %v551_v58, 0.0 }
 0x124   : > { %v910_v8 = vpop.f32.mrf.mxu0 }
 0x125   : > { %v564_v49 = vadd.f32 %v910_v8, %v369_v34  ;;  %v604_v8 = vmax.f32 %v548_v62, 0.0 }
 0x126   : > { %v555_v9 = vpop.f32.mrf.mxu0 }
 0x127   : > { %v608_v56 = vmax.f32 %v564_v49, 0.0  ;;  %v556_v57 = vadd.f32 %v555_v9, %v359_v45  ;;  %v623_v9 = vpack.c.bf16 %v605_v1, %v604_v8 }
 0x128   : > { %v911_v11 = vpop.f32.mrf.mxu0 }
 0x129   : > { %v567_v46 = vadd.f32 %v911_v11, %v374_v28  ;;  %v606_v63 = vmax.f32 %v556_v57, 0.0 }
 0x12a   : > { %v558_v13 = vpop.f32.mrf.mxu0 }
 0x12b   : > { %v609_v52 = vmax.f32 %v567_v46, 0.0  ;;  %v559_v53 = vadd.f32 %v558_v13, %v364_v42  ;;  %v642_v13 = vpop.permute.xlu1 %641 }
 0x12c   : > { %v914_v14 = vpop.f32.mrf.mxu0 }
 0x12d   : > { %v580_v35 = vadd.f32 %v914_v14, %v389_v17  ;;  %v625_v59 = vpack.c.bf16 %v609_v52, %v608_v56  ;;  %v607_v60 = vmax.f32 %v559_v53, 0.0 }
 0x12e   : > { %v571_v16 = vpop.f32.mrf.mxu0 }
 0x12f   : > { %v612_v43 = vmax.f32 %v580_v35, 0.0  ;;  %v572_v44 = vadd.f32 %v571_v16, %v379_v22 }
 0x130   : > { %v915_v18 = vpop.f32.mrf.mxu0 }
 0x131   : > { %v583_v30 = vadd.f32 %v915_v18, %v394_v15  ;;  %v610_v50 = vmax.f32 %v572_v44, 0.0 }
 0x132   : > { %v574_v19 = vpop.f32.mrf.mxu0 }
 0x133   : > { %v613_v39 = vmax.f32 %v583_v30, 0.0  ;;  %v575_v40 = vadd.f32 %v574_v19, %v384_v20 }
 0x134   : > { %v918_v21 = vpop.f32.mrf.mxu0 }
 0x135   : > { %v596_v24 = vadd.f32 %v918_v21, %v409_v7  ;;  %v627_v47 = vpack.c.bf16 %v613_v39, %v612_v43  ;;  %v611_v48 = vmax.f32 %v575_v40, 0.0  ;;  %v624_v7 = vpack.c.bf16 %v607_v60, %v606_v63 }
 0x136   : > { %v587_v23 = vpop.f32.mrf.mxu0  ;;  %v757_v43 = vstv %s756_s15 }
 0x137   : > { %v588_v26 = vadd.f32 %v587_v23, %v399_v5  ;;  %v616_v31 = vmax.f32 %v596_v24, 0.0  ;;  %v626_v54 = vpack.c.bf16 %v611_v48, %v610_v50  ;;  %v543_v5 = vadd.f32 %v1308_v6, %v344_v61  ;;  %v637_v6 = vpop.permute.xlu0 %636 }
 0x138   : > { %v919_v25 = vpop.f32.mrf.mxu0 }
 0x139   : > { %v599_v27 = vadd.f32 %v919_v25, %v414_v12  ;;  %v614_v36 = vmax.f32 %v588_v26, 0.0  ;;  %v603_v4 = vmax.f32 %v543_v5, 0.0 }
 0x13a   : > { %v590_v29 = vpop.f32.mrf.mxu0 }
 0x13b   : > { %v617_v32 = vmax.f32 %v599_v27, 0.0  ;;  %v591_v33 = vadd.f32 %v590_v29, %v404_v10  ;;  %v540_v10 = vadd.f32 %v1306_v3, %v339_v0  ;;  %v647_v14 = vpop.permute.xlu0 %646  ;;  %v652_v3 = vpop.permute.xlu1 %651 }
 0x13d   : > { %v615_v37 = vmax.f32 %v591_v33, 0.0  ;;  %v629_v38 = vpack.c.bf16 %v617_v32, %v616_v31  ;;  %v602_v11 = vmax.f32 %v540_v10, 0.0 }
 0x13f   : > { %v628_v41 = vpack.c.bf16 %v615_v37, %v614_v36  ;;  %920 = vmatprep.subr.bf16.mxu1 %v629_v38  ;;  %v622_v12 = vpack.c.bf16 %v603_v4, %v602_v11  ;;  %v726_v20 = vpop.permute.xlu0 %725  ;;  %v731_v25 = vpop.permute.xlu1 %730 }
 0x140   : > { %921 = vmatpush3.bf16.msra.mxu1 %v629_v38 }
 0x141   : > { %922 = vmatprep.subr.bf16.mxu1 %v628_v41 }
 0x143   : > { %v736_v31 = vpop.permute.xlu0 %735  ;;  %v741_v34 = vpop.permute.xlu1 %740 }
 0x144   : > { %923 = vmatpush3.bf16.msra.mxu1 %v628_v41 }
 0x145   : > { %924 = vmatprep.subr.bf16.mxu1 %v627_v47 }
 0x148   : > { %925 = vmatpush3.bf16.msra.mxu1 %v627_v47 }
 0x149   : > { %926 = vmatprep.subr.bf16.mxu1 %v626_v54 }
 0x14c   : > { %927 = vmatpush3.bf16.msra.mxu1 %v626_v54 }
 0x14d   : > { %928 = vmatprep.subr.bf16.mxu1 %v625_v59 }
 0x150   : > { %929 = vmatpush3.bf16.msra.mxu1 %v625_v59 }
 0x151   : > { %930 = vmatprep.subr.bf16.mxu1 %v624_v7 }
 0x154   : > { %931 = vmatpush3.bf16.msra.mxu1 %v624_v7 }
 0x155   : > { %932 = vmatprep.subr.bf16.mxu1 %v623_v9 }
 0x158   : > { %933 = vmatpush3.bf16.msra.mxu1 %v623_v9 }
 0x159   : > { %934 = vmatprep.subr.bf16.mxu1 %v622_v12 }
 0x15c   : > { %935 = vmatpush3.bf16.msra.mxu1 %v622_v12 }
 0x15f   : > { %937 = vmatmul.mubr.bf16.vlgmr.msra.gmra.mxu1 %v999_v2 }
 0x21f   : > { %v938_v15 = vpop.f32.mrf.mxu1 }
 0x220   : > { %v709_v19 = vadd.f32 %v938_v15, %v647_v14 }
 0x221   : > { %v700_v16 = vpop.f32.mrf.mxu1 }
 0x222   : > { %v701_v17 = vadd.f32 %v700_v16, %v637_v6  ;;  %v717_v26 = vmax.f32 %v709_v19, 0.0 }
 0x223   : > { %v939_v18 = vpop.f32.mrf.mxu1 }
 0x224   : > { %v715_v22 = vmax.f32 %v701_v17, 0.0  ;;  %v712_v23 = vadd.f32 %v939_v18, %v652_v3  ;;  %v745_v32 = vmul.f32 %v736_v31, %v717_v26 }
 0x225   : > { %v703_v21 = vpop.f32.mrf.mxu1 }
 0x226   : > { %v704_v24 = vadd.f32 %v703_v21, %v642_v13  ;;  %v743_v28 = vmul.f32 %v726_v20, %v715_v22  ;;  %v718_v29 = vmax.f32 %v712_v23, 0.0 }
 0x228   : > { %v716_v27 = vmax.f32 %v704_v24, 0.0  ;;  %v746_v35 = vmul.f32 %v741_v34, %v718_v29 }
 0x22a   : > { %v744_v30 = vmul.f32 %v731_v25, %v716_v27 }
 0x22c   : > { %v747_v33 = vadd.f32 %v744_v30, %v743_v28 }
 0x22e   : > { %v748_v36 = vadd.f32 %v747_v33, %v745_v32 }
 0x230   : > { %v749_v37 = vadd.f32 %v748_v36, %v746_v35 }
 0x232   : > { %v750_v38 = vrot.slane %v749_v37, 4 }
 0x234   : > { %v751_v39 = vadd.f32 %v750_v38, %v749_v37 }
 0x236   : > { %v752_v40 = vrot.slane %v751_v39, 2 }
 0x238   : > { %v753_v41 = vadd.f32 %v752_v40, %v751_v39 }
 0x23a   : > { %v754_v42 = vrot.slane %v753_v41, 1 }
 0x23c   : > { %v755_v44 = vadd.f32 %v754_v42, %v753_v41 }
 0x23e   : > { %v758_v45 = vadd.f32 %v757_v43, %v755_v44 }
 0x240   : > { %v858_v46 = vmul.f32 -1.442695, %v758_v45 }
 0x242   : > { %1000 = vpow2.f32 %v858_v46 }
 0x24f   : > { %v1001_v47 = vpop.eup %1000 }
 0x250   : > { %v762_v48 = vadd.f32 1.0, %v1001_v47 }
 0x252   : > { %1002 = vrcp.f32 %v762_v48 }
 0x25f   : > { %v1003_v49 = vpop.eup %1002 }
 0x260   : > { %765 = vst [vmem:[%s272_s17] sm:$0x1] %v1003_v49 }
 0x261   : > { %1017 = shalt.err (!%p1014_p3)
}
 0x262   : > { %s1018_s14 = scalar_lea.hbm %s1321_s22, 16  ;;  %s1022_s10 = scalar_lea.hbm %s1363_s7, 32 }
 0x263   : > { %p1019_p4 = scmp.ne.s32.totalorder %s1321_s22, %s1018_s14  ;;  %p1023_p9 = scmp.lt.s32.totalorder %s1321_s22, %s1363_s7 }
 0x264   : > { %p1024_p10 = scmp.lt.s32.totalorder %s1022_s10, %s1018_s14 }
 0x265   : > { %p1020_p7 = pnand %p1019_p4, %p1146_p5 }
 0x266   : > { %p1025_p11 = por %p1024_p10, %p1023_p9 }
 0x267   : > { %p1021_p8 = pneg %p1020_p7 }
 0x269   : > { %p1026_p12 = pnand %p1025_p11, %p1021_p8 }
 0x26b   : > { %1029 = shalt.err (!%p1026_p12)
}
 0x26c   : > { %948 = dma.vmem_to_hbm [thread:$0]  (%p1146_p5), %s780_s18, 16, %s1321_s22, %s767_s23  }
 0x26d PF: > { %p954_p13 = scmp.ge.s32.totalorder %s1064_s29, 2  ;;  %s791_s17 = sand.u32 1, %s1052_s26  }
 0x26e   : > { %s792_s19 = scalar_lea.sflag [#allocation4], %s791_s17 }
 0x26f   : > { %p951_p0 = pnand %p954_p13, %p1150_p6 }
 0x271   : > { %p952_p1 = pneg %p951_p0 }
 0x273   : > { %1047 = dma.done.wait (%p952_p1), %s792_s19, 16  }
 0x274   : > { %1049 = vsyncadd (%p952_p1), %s792_s19, 4294967280  ;;  %p18_p2 = scmp.ge.s32.totalorder %s1134_s8, 4   ;;  %s1366_s26 = smov %s1056_s27 }
 0x275   : > { %s1367_s27 = smov %s1060_s28  ;;  %s1368_s28 = smov %s1144_s11 }
 0x276   : > { %s1369_s29 = smov %s1134_s8  ;;  %20 = sbr.rel (!%p18_p2) target bundleno = 5 (0x5), region = 83 }
 0x27b   :  { %796 = vsyncpa [#allocation4], 1 }
 0x27c   :  { %798 = vsyncpa [#allocation4 + $0x1], 1 }

</bundles_post_ra>
